<compile_context>
chip_gen: v7x
topology: tpu7x:2x2x1
jax: 0.10.0
libtpu: 0.0.40
codegen_flags: <defaults>
</compile_context>

<pallas_src>
import math

import jax
import jax.numpy as jnp
from jax.experimental import pallas as pl
from jax.experimental.pallas import tpu as pltpu

IN_DIM = 4     # iris features
OUT_DIM = 3    # iris classes
IN_PAD = 16    # pad K to bf16 sublane-pack granularity
LANE = 128     # pad output features to the 128-lane vreg width


def _round_up(a, m):
    return ((a + m - 1) // m) * m


# ----------------------------------------------------------------------------- kernel
def affine_kernel(x_ref, w_ref, b_ref, o_ref):
    # x: (tile_b, 16) bf16; w: (16, 128) bf16; b: (1, 128) f32; o: (tile_b, 128) f32.
    # Single full-width MXU matmul with f32 accumulation, bias add in f32,
    # unmasked lane-dense store.
    o_ref[...] = (
        jnp.dot(x_ref[...], w_ref[...], preferred_element_type=jnp.float32)
        + b_ref[...]
    )


# ------------------------------------------------------------------- one-time param prep
def prepare_params(params):
    """Fold the 3 linear layers into one padded affine map. Run ONCE, not per call."""
    (w1, b1), (w2, b2), (w3, b3) = params
    # Fold in f32 (exact, since the module has no activations).
    w_folded = w1 @ w2 @ w3                      # (4, 3)
    b_folded = (b1 @ w2 + b2) @ w3 + b3          # (1, 3)
    # Zero-pad to lane-dense / MXU-aligned shapes; cast weight to bf16 once.
    w_pad = jnp.zeros((IN_PAD, LANE), jnp.float32).at[:IN_DIM, :OUT_DIM].set(w_folded)
    b_pad = jnp.zeros((1, LANE), jnp.float32).at[:, :OUT_DIM].set(b_folded)
    return w_pad.astype(jnp.bfloat16), b_pad


# ----------------------------------------------------------------------------- wrapper
@jax.jit
def _iris_mlp_impl(x, w_pad, b_pad):
    B = x.shape[0]

    # Batch tiling: multiple-of-8 sublane tiles, cap 1024 rows; for B > 8 force at
    # least 2 tiles so both v7x TensorCores are used (no effect at tiny B).
    if B <= 8:
        tile_b = 8
    else:
        tile_b = min(1024, _round_up(-(-B // 2), 8))
    b_padded = _round_up(B, tile_b)

    # Pad batch to a tile multiple and features 4 -> 16; cast to bf16 for the MXU.
    xp = jnp.pad(x, ((0, b_padded - B), (0, IN_PAD - IN_DIM))).astype(jnp.bfloat16)

    out = pl.pallas_call(
        affine_kernel,
        out_shape=jax.ShapeDtypeStruct((b_padded, LANE), jnp.float32),
        grid=(b_padded // tile_b,),
        in_specs=[
            pl.BlockSpec((tile_b, IN_PAD), lambda i: (i, 0)),  # x: tiled over batch
            pl.BlockSpec((IN_PAD, LANE), lambda i: (0, 0)),    # folded W (resident)
            pl.BlockSpec((1, LANE), lambda i: (0, 0)),         # folded bias (resident)
        ],
        out_specs=pl.BlockSpec((tile_b, LANE), lambda i: (i, 0)),
        compiler_params=pltpu.CompilerParams(
            dimension_semantics=("parallel",)  # shard batch tiles across TCs on v7x
        ),
    )(xp, w_pad, b_pad)

    return out[:B, :OUT_DIM]


def iris_mlp(x, prepared_params):
    w_pad, b_pad = prepared_params
    return _iris_mlp_impl(x, w_pad, b_pad)


# --------------------------------------------------------------------------------- init
def init_linear(key, fan_in, fan_out):
    # Mimic torch.nn.Linear default init: U(-1/sqrt(fan_in), 1/sqrt(fan_in)).
    kw, kb = jax.random.split(key)
    bound = 1.0 / math.sqrt(fan_in)
    # Stored as (in, out) so the math is x @ W (== torch's x @ W.T).
    w = jax.random.uniform(kw, (fan_in, fan_out), jnp.float32, -bound, bound)
    b = jax.random.uniform(kb, (1, fan_out), jnp.float32, -bound, bound)
    return w, b


if __name__ == "__main__":
    key = jax.random.PRNGKey(0)
    kx, k1, k2, k3 = jax.random.split(key, 4)

    B = 8  # small batch of iris-like rows with 4 features each
    x = jax.random.uniform(kx, (B, IN_DIM), jnp.float32, 0.0, 8.0)

    params = (
        init_linear(k1, IN_DIM, 128),
        init_linear(k2, 128, 64),
        init_linear(k3, 64, OUT_DIM),
    )

    prepared = prepare_params(params)  # one-time fold + pad + cast (off dispatch path)
    out = jax.block_until_ready(iris_mlp(x, prepared))
    assert out.shape == (B, OUT_DIM)

    # Reference 1: same folded bf16-weight / f32-accumulation math as the kernel.
    w_pad, b_pad = prepared
    ref_folded = (
        jnp.dot(
            jnp.pad(x, ((0, 0), (0, IN_PAD - IN_DIM))).astype(jnp.bfloat16),
            w_pad,
            preferred_element_type=jnp.float32,
        )
        + b_pad
    )[:, :OUT_DIM]
    assert jnp.allclose(out, ref_folded, atol=1e-2, rtol=1e-2)

    # Reference 2: full-f32 sequential math (the exact torch module) with bf16-level
    # tolerance (x and the folded weight are cast to bf16 once in the kernel path).
    (w1, b1), (w2, b2), (w3, b3) = params
    ref_f32 = ((x @ w1 + b1) @ w2 + b2) @ w3 + b3
    assert jnp.allclose(out, ref_f32, atol=1e-1, rtol=5e-2)

    print("KERNEL_OK")
</pallas_src>

<mosaic_0001>
module attributes {stable_mosaic.version = 11 : i64} {
  func.func @affine_kernel(%arg0: i32, %arg1: memref<8x16xbf16, #tpu.memory_space<vmem>>, %arg2: memref<16x128xbf16, #tpu.memory_space<vmem>>, %arg3: memref<1x128xf32, #tpu.memory_space<vmem>>, %arg4: memref<8x128xf32, #tpu.memory_space<vmem>>) attributes {dimension_semantics = [#tpu.dimension_semantics<parallel>], iteration_bounds = array<i64: 1>, scalar_prefetch = 0 : i64, scratch_operands = 0 : i64, tpu.core_type = #tpu.core_type<tc>, window_params = [{transform_indices = @transform_0, window_bounds = array<i64: 8, 16>}, {pipeline_mode = #tpu.pipeline_mode<synchronous>, transform_indices = @transform_1, window_bounds = array<i64: 16, 128>}, {pipeline_mode = #tpu.pipeline_mode<synchronous>, transform_indices = @transform_2, window_bounds = array<i64: 1, 128>}, {transform_indices = @transform_3, window_bounds = array<i64: 8, 128>}]} {
    %c0 = arith.constant 0 : index
    %c0_0 = arith.constant 0 : index
    %0 = vector.load %arg1[%c0, %c0_0] : memref<8x16xbf16, #tpu.memory_space<vmem>>, vector<8x16xbf16>
    %c0_1 = arith.constant 0 : index
    %c0_2 = arith.constant 0 : index
    %1 = vector.load %arg2[%c0_1, %c0_2] : memref<16x128xbf16, #tpu.memory_space<vmem>>, vector<16x128xbf16>
    %cst = arith.constant dense<0.000000e+00> : vector<8x128xf32>
    %2 = tpu.matmul %0, %1, %cst {dimension_numbers = #tpu.dot_dimension_numbers<[1], [0], [0], [1], [0, 0, 1, 1], [], []>} : vector<8x16xbf16>, vector<16x128xbf16>, vector<8x128xf32> -> vector<8x128xf32>
    %c0_3 = arith.constant 0 : index
    %c0_4 = arith.constant 0 : index
    %3 = vector.load %arg3[%c0_3, %c0_4] : memref<1x128xf32, #tpu.memory_space<vmem>>, vector<1x128xf32>
    %4 = vector.broadcast %3 : vector<1x128xf32> to vector<8x128xf32>
    %5 = arith.addf %2, %4 : vector<8x128xf32>
    %c0_5 = arith.constant 0 : index
    %c0_6 = arith.constant 0 : index
    %6 = vector.load %arg4[%c0_5, %c0_6] : memref<8x128xf32, #tpu.memory_space<vmem>>, vector<8x128xf32>
    tpu.vector_store %arg4[%c0_5, %c0_6], %5 {strides = array<i32>} : memref<8x128xf32, #tpu.memory_space<vmem>>, vector<8x128xf32>,
    return
  }
  func.func @transform_0(%arg0: i32) -> (i32, i32) {
    %c0_i32 = arith.constant 0 : i32
    %c0_i32_0 = arith.constant 0 : i32
    return %arg0, %c0_i32 : i32, i32
  }
  func.func @transform_1(%arg0: i32) -> (i32, i32) {
    %c0_i32 = arith.constant 0 : i32
    %c0_i32_0 = arith.constant 0 : i32
    %c0_i32_1 = arith.constant 0 : i32
    return %c0_i32, %c0_i32_0 : i32, i32
  }
  func.func @transform_2(%arg0: i32) -> (i32, i32) {
    %c0_i32 = arith.constant 0 : i32
    %c0_i32_0 = arith.constant 0 : i32
    %c0_i32_1 = arith.constant 0 : i32
    return %c0_i32, %c0_i32_0 : i32, i32
  }
  func.func @transform_3(%arg0: i32) -> (i32, i32) {
    %c0_i32 = arith.constant 0 : i32
    %c0_i32_0 = arith.constant 0 : i32
    return %arg0, %c0_i32 : i32, i32
  }
}

</mosaic_0001>

<bundles_post_ra>
// kernel: _iris_mlp_impl.1
= control target key start
LH: loop header
LB: loop body
LE: loop exit
PB: predicated region body
PF: predicated region fallthrough
CT: control target
= control target key end

     0   :  { %v94_v0 = vmov 0.0   ;;  %vm95_vm0 = vmmov 0   ;;  %vm31_vm1 = vcmask 130048   ;;  %s128_s1 = inlined_call_operand.vmem [shape: bf16[16,128], index: 1, kind: input, shape index: {}]   ;;  %s129_s0 = inlined_call_operand.vmem [shape: bf16[8,16], index: 0, kind: input, shape index: {}]   ;;  %s130_s2 = inlined_call_operand.vmem [shape: f32[1,128], index: 2, kind: input, shape index: {}]   ;;  %s131_s3 = inlined_call_operand.vmem [shape: f32[8,128], index: 3, kind: output, shape index: {}]  }
   0x1   :  { %85 = vmatprep.subr.bf16.mxu0 %v94_v0  ;;  %v93_v1 = vld [vmem:[%s128_s1] sm:$0xff]   ;;  %87 = vmatprep.mubr.msk.bf16.mxu0 %vm95_vm0, %v94_v0 }
   0x2   :  { %86 = vmatpush3.bf16.msra.mxu0 %v93_v1  ;;  %v15_v2 = vld [vmem:[%s129_s0] sm:$0xf] }
   0x3   :  { %v80_v3 = vld [vmem:[%s130_s2] ss:$0 sm:$0xff] }
   0x5   :  { %88 = vmatmul.mubr.msk.bf16.vlgmr.msra.gmra.mrb[0].mxu0 %vm31_vm1, %v15_v2 }
  0xd8   :  { %v69_v4 = vpop.f32.mrb[0].mxu0 }
  0xd9   :  { %v70_v5 = vadd.f32 %v80_v3, %v69_v4  ;;  %v89_v6 = vpop.f32.mrb[1].mxu0 }
  0xda   :  { %v72_v7 = vpop.f32.mrb[2].mxu0 }
  0xdb   :  { %75 = vst [vmem:[%s131_s3] sm:$0xff] %v70_v5  ;;  %v90_v8 = vpop.f32.mrb[3].mxu0 }

</bundles_post_ra>
